<compile_context>
chip_gen: v6e
topology: v6e:2x2x1
jax: 0.10.0
libtpu: 0.0.40
codegen_flags: <defaults>
</compile_context>

<pallas_src>
import jax
import jax.numpy as jnp
from jax.experimental import pallas as pl
from jax.experimental.pallas import tpu as pltpu


# --------------------------------------------------------------------------
# Path A: table VMEM-resident, gather via one-hot MXU matmul.
# --------------------------------------------------------------------------
def _embed_ln_vmem_kernel(ids_ref, table_ref, gamma_ref, beta_ref, out_ref):
    # ids_ref:   (TS, 1) int32   VMEM
    # table_ref: (V, D)  table   VMEM (resident across grid steps)
    # gamma/beta:(1, D)  f32     VMEM (shared across grid steps)
    # out_ref:   (TS, D) out dt  VMEM
    ts = out_ref.shape[0]
    v = table_ref.shape[0]

    ids = ids_ref[...]                                             # (TS, 1)
    vocab_iota = jax.lax.broadcasted_iota(jnp.int32, (ts, v), 1)   # (TS, V)
    one_hot = (ids == vocab_iota).astype(table_ref.dtype)          # (TS, V)
    # Row gather as a one-hot matmul on the otherwise-idle MXU.  Exactly one
    # nonzero (1.0) per row -> bit-exact row selection, accumulated in f32.
    emb = jnp.dot(one_hot, table_ref[...], preferred_element_type=jnp.float32)

    # Fused LayerNorm in f32, two-pass variance for numerical safety.
    mean = jnp.mean(emb, axis=-1, keepdims=True)
    centered = emb - mean
    var = jnp.mean(centered * centered, axis=-1, keepdims=True)
    xhat = centered * jax.lax.rsqrt(var + 1e-5)

    # Dropout in eval mode is the identity.
    out_ref[...] = (xhat * gamma_ref[...] + beta_ref[...]).astype(out_ref.dtype)


# --------------------------------------------------------------------------
# Path B: table HBM-resident, per-row DMA gather double-buffered across tiles.
# --------------------------------------------------------------------------
def _embed_ln_hbm_kernel(ids_smem, table_hbm, gamma_ref, beta_ref, out_ref,
                         gbuf, sems):
    # ids_smem: (S_pad,)        int32   SMEM (scalar prefetch)
    # table_hbm:(V, D)          table   HBM  (pl.ANY) -- manual DMA gather
    # gamma/beta:(1, D)         f32     VMEM
    # out_ref:  (TS, D)         out dt  VMEM
    # gbuf:     (2, TS, D)      table   VMEM scratch (double buffer)
    # sems:     (2,)            DMA semaphores (one per slot)
    tile = pl.program_id(0)
    n_tiles = pl.num_programs(0)
    ts, _ = out_ref.shape
    slot = tile & 1

    def issue_gathers(t, s):
        # One row DMA per token; all signal the shared per-slot semaphore.
        def body(r, carry):
            tok = ids_smem[t * ts + r]
            pltpu.make_async_copy(
                table_hbm.at[pl.ds(tok, 1), :],
                gbuf.at[s, pl.ds(r, 1), :],
                sems.at[s],
            ).start()
            return carry
        jax.lax.fori_loop(0, ts, body, 0, unroll=4)

    def wait_gathers(s):
        # One wait per issued copy on the shared semaphore (same row size).
        def body(r, carry):
            pltpu.make_async_copy(
                table_hbm.at[pl.ds(0, 1), :],
                gbuf.at[s, pl.ds(0, 1), :],
                sems.at[s],
            ).wait()
            return carry
        jax.lax.fori_loop(0, ts, body, 0, unroll=4)

    # Prime: the very first tile gathers its own rows.
    @pl.when(tile == 0)
    def _():
        issue_gathers(0, 0)

    # Prefetch the NEXT tile's rows (ids are fully resident in SMEM) into the
    # other slot before computing on this one -> DMA latency hides behind LN.
    @pl.when(tile + 1 < n_tiles)
    def _():
        issue_gathers(tile + 1, 1 - slot)

    wait_gathers(slot)

    emb = gbuf[slot].astype(jnp.float32)                          # (TS, D)
    mean = jnp.mean(emb, axis=-1, keepdims=True)
    centered = emb - mean
    var = jnp.mean(centered * centered, axis=-1, keepdims=True)
    xhat = centered * jax.lax.rsqrt(var + 1e-5)

    out_ref[...] = (xhat * gamma_ref[...] + beta_ref[...]).astype(out_ref.dtype)


# --------------------------------------------------------------------------
# Wrapper
# --------------------------------------------------------------------------
def _vmem_table_budget_bytes():
    """Per-generation cutoff for keeping the table VMEM-resident.

    3/8 of physical VMEM: ~24 MiB on v7x (64 MiB/core), ~48 MiB on v5e/v6e
    (128 MiB).  Conservative fallback if the query is unavailable.
    """
    try:
        cap = int(pltpu.get_tpu_info().vmem_capacity_bytes)
    except Exception:
        cap = 64 * 1024 * 1024
    return (3 * cap) // 8


def _pick_tile_s(S):
    # Big tiles amortize the ~0.35us per-grid-step overhead; for short
    # sequences still aim for >= 2 tiles so v7x's two TensorCores both work.
    if S >= 1024:
        return 512
    if S >= 16:
        half = -(-S // 2)
        return max(8, ((half + 7) // 8) * 8)
    return 8


def input_embedding_forward(input_ids, table, gamma, beta, *, tile_s=None,
                            out_dtype=None, force_hbm_gather=False):
    """input_ids: (S,) int; table: (V, D); gamma/beta: (D,) -> (S, D)."""
    S = int(input_ids.shape[0])
    V, D = (int(d) for d in table.shape)
    out_dtype = table.dtype if out_dtype is None else out_dtype

    if tile_s is None:
        tile_s = _pick_tile_s(S)
    tile_s = max(8, ((int(tile_s) + 7) // 8) * 8)
    n_tiles = -(-S // tile_s)
    s_pad = n_tiles * tile_s

    # Clamp ids so the gather can never read outside the table
    # (nn.Embedding would raise on OOB ids; we clamp instead).
    ids = jnp.clip(input_ids.astype(jnp.int32), 0, V - 1)
    if s_pad != S:
        ids = jnp.pad(ids, (0, s_pad - S))

    gamma2d = gamma.reshape(1, D).astype(jnp.float32)
    beta2d = beta.reshape(1, D).astype(jnp.float32)

    itemsize = jnp.dtype(table.dtype).itemsize
    out_itemsize = jnp.dtype(out_dtype).itemsize
    table_bytes = V * D * itemsize
    work_bytes = 4 * tile_s * D * 4      # double-buffered ids/out/intermediates
    budget = _vmem_table_budget_bytes()

    use_vmem_table = ((not force_hbm_gather)
                      and (2 * table_bytes + work_bytes <= budget)
                      and V <= 4096)

    if use_vmem_table:
        needed = 2 * table_bytes + work_bytes + (4 << 20)
        vmem_limit = int(needed) if needed > (24 << 20) else None
        cost = pl.CostEstimate(
            flops=2 * s_pad * V * D + 8 * s_pad * D,
            transcendentals=s_pad,
            bytes_accessed=table_bytes + s_pad * (4 + D * out_itemsize) + 2 * D * 4,
        )
        out = pl.pallas_call(
            _embed_ln_vmem_kernel,
            out_shape=jax.ShapeDtypeStruct((s_pad, D), out_dtype),
            grid_spec=pltpu.PrefetchScalarGridSpec(
                num_scalar_prefetch=0,
                grid=(n_tiles,),
                in_specs=[
                    pl.BlockSpec((tile_s, 1), lambda i: (i, 0)),   # token ids
                    pl.BlockSpec((V, D), lambda i: (0, 0)),        # table (VMEM-resident)
                    pl.BlockSpec((1, D), lambda i: (0, 0)),        # gamma
                    pl.BlockSpec((1, D), lambda i: (0, 0)),        # beta
                ],
                out_specs=pl.BlockSpec((tile_s, D), lambda i: (i, 0)),
            ),
            compiler_params=pltpu.CompilerParams(
                dimension_semantics=("parallel",),   # v7x: 2 TCs split tiles
                vmem_limit_bytes=vmem_limit,
            ),
            cost_estimate=cost,
        )(ids.reshape(s_pad, 1), table, gamma2d, beta2d)
    else:
        cost = pl.CostEstimate(
            flops=10 * s_pad * D,
            transcendentals=s_pad,
            bytes_accessed=s_pad * D * (itemsize + out_itemsize) + s_pad * 4 + 2 * D * 4,
        )
        out = pl.pallas_call(
            _embed_ln_hbm_kernel,
            out_shape=jax.ShapeDtypeStruct((s_pad, D), out_dtype),
            grid_spec=pltpu.PrefetchScalarGridSpec(
                num_scalar_prefetch=1,
                grid=(n_tiles,),
                in_specs=[
                    pl.BlockSpec(memory_space=pl.ANY),              # table (HBM)
                    pl.BlockSpec((1, D), lambda i, ids: (0, 0)),    # gamma
                    pl.BlockSpec((1, D), lambda i, ids: (0, 0)),    # beta
                ],
                out_specs=pl.BlockSpec((tile_s, D), lambda i, ids: (i, 0)),
                scratch_shapes=[
                    pltpu.VMEM((2, tile_s, D), table.dtype),  # gather double buffer
                    pltpu.SemaphoreType.DMA((2,)),            # one sem per slot
                ],
            ),
            compiler_params=pltpu.CompilerParams(
                # Cross-tile prefetch carries state -> must run sequentially.
                dimension_semantics=("arbitrary",),
            ),
            cost_estimate=cost,
        )(ids, table, gamma2d, beta2d)

    return out if s_pad == S else out[:S]


def tokenize(input_text):
    """Replicates InputEmbedding.tokenized: first-seen word -> its position index."""
    # TODO(synk): pure Python string processing; no Pallas equivalent.
    str2idx = {}
    words = input_text.split()
    for idx, word in enumerate(words):
        if word not in str2idx:
            str2idx[word] = idx
    return [str2idx[w] for w in words]


if __name__ == "__main__":
    # Module hyperparameters (small, TPU-friendly).
    dim_model = 128
    vocab_size = 32
    dropout_p = 0.1  # eval mode -> identity

    # Deterministic init (nn.Embedding ~ N(0,1); LayerNorm gamma=1, beta=0).
    # Table stored bf16; LN math stays f32, output also bf16.
    key = jax.random.PRNGKey(0)
    k_tab, k_ids = jax.random.split(key)
    table = jax.random.normal(k_tab, (vocab_size, dim_model),
                              dtype=jnp.float32).astype(jnp.bfloat16)
    gamma = jnp.ones((dim_model,), dtype=jnp.float32)
    beta = jnp.zeros((dim_model,), dtype=jnp.float32)

    def reference(ids):
        emb = table[ids].astype(jnp.float32)
        mu = emb.mean(-1, keepdims=True)
        va = ((emb - mu) ** 2).mean(-1, keepdims=True)
        return (emb - mu) / jnp.sqrt(va + 1e-5) * gamma + beta

    # --- Path A (default): VMEM-resident table, one-hot MXU gather ---------
    input_text = "the cat sat on the mat the end"
    input_ids = jnp.asarray(tokenize(input_text), dtype=jnp.int32)  # (8,)
    out_a = input_embedding_forward(input_ids, table, gamma, beta)
    jax.block_until_ready(out_a)
    ref_a = reference(input_ids)
    assert out_a.shape == (input_ids.shape[0], dim_model)
    assert out_a.dtype == table.dtype
    assert jnp.max(jnp.abs(out_a.astype(jnp.float32) - ref_a)) < 5e-2

    # --- Path B (forced): HBM table, double-buffered DMA gather (3 tiles) ---
    ids_b = jax.random.randint(k_ids, (24,), 0, vocab_size, dtype=jnp.int32)
    out_b = input_embedding_forward(ids_b, table, gamma, beta,
                                    tile_s=8, force_hbm_gather=True)
    jax.block_until_ready(out_b)
    ref_b = reference(ids_b)
    assert out_b.shape == (ids_b.shape[0], dim_model)
    assert jnp.max(jnp.abs(out_b.astype(jnp.float32) - ref_b)) < 5e-2

    print("KERNEL_OK")
</pallas_src>

<mosaic_0001>
module attributes {stable_mosaic.version = 11 : i64} {
  func.func @_embed_ln_vmem_kernel(%arg0: i32, %arg1: memref<8x1xi32, #tpu.memory_space<vmem>>, %arg2: memref<32x128xbf16, #tpu.memory_space<vmem>>, %arg3: memref<1x128xf32, #tpu.memory_space<vmem>>, %arg4: memref<1x128xf32, #tpu.memory_space<vmem>>, %arg5: memref<8x128xbf16, #tpu.memory_space<vmem>>) attributes {dimension_semantics = [#tpu.dimension_semantics<parallel>], iteration_bounds = array<i64: 1>, scalar_prefetch = 0 : i64, scratch_operands = 0 : i64, tpu.core_type = #tpu.core_type<tc>, window_params = [{transform_indices = @transform_0, window_bounds = array<i64: 8, 1>}, {pipeline_mode = #tpu.pipeline_mode<synchronous>, transform_indices = @transform_1, window_bounds = array<i64: 32, 128>}, {pipeline_mode = #tpu.pipeline_mode<synchronous>, transform_indices = @transform_2, window_bounds = array<i64: 1, 128>}, {pipeline_mode = #tpu.pipeline_mode<synchronous>, transform_indices = @transform_3, window_bounds = array<i64: 1, 128>}, {transform_indices = @transform_4, window_bounds = array<i64: 8, 128>}]} {
    %c0 = arith.constant 0 : index
    %c0_0 = arith.constant 0 : index
    %0 = vector.load %arg1[%c0, %c0_0] : memref<8x1xi32, #tpu.memory_space<vmem>>, vector<8x1xi32>
    %1 = tpu.iota {dimensions = array<i32: 1>} : vector<8x32xi32>
    %2 = vector.broadcast %0 : vector<8x1xi32> to vector<8x32xi32>
    %3 = arith.cmpi eq, %2, %1 : vector<8x32xi32>
    %4 = arith.extui %3 : vector<8x32xi1> to vector<8x32xi32>
    %5 = arith.sitofp %4 : vector<8x32xi32> to vector<8x32xf32>
    %6 = arith.truncf %5 : vector<8x32xf32> to vector<8x32xbf16>
    %c0_1 = arith.constant 0 : index
    %c0_2 = arith.constant 0 : index
    %7 = vector.load %arg2[%c0_1, %c0_2] : memref<32x128xbf16, #tpu.memory_space<vmem>>, vector<32x128xbf16>
    %cst = arith.constant dense<0.000000e+00> : vector<8x128xf32>
    %8 = tpu.matmul %6, %7, %cst {dimension_numbers = #tpu.dot_dimension_numbers<[1], [0], [0], [1], [0, 0, 1, 1], [], []>} : vector<8x32xbf16>, vector<32x128xbf16>, vector<8x128xf32> -> vector<8x128xf32>
    %cst_3 = arith.constant dense<0.000000e+00> : vector<8xf32>
    %9 = vector.multi_reduction <add>, %8, %cst_3 [1] : vector<8x128xf32> to vector<8xf32>
    %10 = vector.shape_cast %9 : vector<8xf32> to vector<8x1xf32>
    %cst_4 = arith.constant 1.280000e+02 : f32
    %11 = vector.broadcast %cst_4 : f32 to vector<8x1xf32>
    %12 = arith.divf %10, %11 : vector<8x1xf32>
    %13 = vector.broadcast %12 : vector<8x1xf32> to vector<8x128xf32>
    %14 = arith.subf %8, %13 : vector<8x128xf32>
    %15 = arith.mulf %14, %14 : vector<8x128xf32>
    %cst_5 = arith.constant dense<0.000000e+00> : vector<8xf32>
    %16 = vector.multi_reduction <add>, %15, %cst_5 [1] : vector<8x128xf32> to vector<8xf32>
    %17 = vector.shape_cast %16 : vector<8xf32> to vector<8x1xf32>
    %cst_6 = arith.constant 1.280000e+02 : f32
    %18 = vector.broadcast %cst_6 : f32 to vector<8x1xf32>
    %19 = arith.divf %17, %18 : vector<8x1xf32>
    %cst_7 = arith.constant 9.99999974E-6 : f32
    %20 = vector.broadcast %cst_7 : f32 to vector<8x1xf32>
    %21 = arith.addf %19, %20 : vector<8x1xf32>
    %22 = math.rsqrt %21 : vector<8x1xf32>
    %23 = vector.broadcast %22 : vector<8x1xf32> to vector<8x128xf32>
    %24 = arith.mulf %14, %23 : vector<8x128xf32>
    %c0_8 = arith.constant 0 : index
    %c0_9 = arith.constant 0 : index
    %25 = vector.load %arg3[%c0_8, %c0_9] : memref<1x128xf32, #tpu.memory_space<vmem>>, vector<1x128xf32>
    %26 = vector.broadcast %25 : vector<1x128xf32> to vector<8x128xf32>
    %27 = arith.mulf %24, %26 : vector<8x128xf32>
    %c0_10 = arith.constant 0 : index
    %c0_11 = arith.constant 0 : index
    %28 = vector.load %arg4[%c0_10, %c0_11] : memref<1x128xf32, #tpu.memory_space<vmem>>, vector<1x128xf32>
    %29 = vector.broadcast %28 : vector<1x128xf32> to vector<8x128xf32>
    %30 = arith.addf %27, %29 : vector<8x128xf32>
    %31 = arith.truncf %30 : vector<8x128xf32> to vector<8x128xbf16>
    %c0_12 = arith.constant 0 : index
    %c0_13 = arith.constant 0 : index
    %32 = vector.load %arg5[%c0_12, %c0_13] : memref<8x128xbf16, #tpu.memory_space<vmem>>, vector<8x128xbf16>
    tpu.vector_store %arg5[%c0_12, %c0_13], %31 {strides = array<i32>} : memref<8x128xbf16, #tpu.memory_space<vmem>>, vector<8x128xbf16>,
    return
  }
  func.func @transform_0(%arg0: i32) -> (i32, i32) {
    %c0_i32 = arith.constant 0 : i32
    %c0_i32_0 = arith.constant 0 : i32
    return %arg0, %c0_i32 : i32, i32
  }
  func.func @transform_1(%arg0: i32) -> (i32, i32) {
    %c0_i32 = arith.constant 0 : i32
    %c0_i32_0 = arith.constant 0 : i32
    %c0_i32_1 = arith.constant 0 : i32
    return %c0_i32, %c0_i32_0 : i32, i32
  }
  func.func @transform_2(%arg0: i32) -> (i32, i32) {
    %c0_i32 = arith.constant 0 : i32
    %c0_i32_0 = arith.constant 0 : i32
    %c0_i32_1 = arith.constant 0 : i32
    return %c0_i32, %c0_i32_0 : i32, i32
  }
  func.func @transform_3(%arg0: i32) -> (i32, i32) {
    %c0_i32 = arith.constant 0 : i32
    %c0_i32_0 = arith.constant 0 : i32
    %c0_i32_1 = arith.constant 0 : i32
    return %c0_i32, %c0_i32_0 : i32, i32
  }
  func.func @transform_4(%arg0: i32) -> (i32, i32) {
    %c0_i32 = arith.constant 0 : i32
    %c0_i32_0 = arith.constant 0 : i32
    return %arg0, %c0_i32 : i32, i32
  }
}

</mosaic_0001>

<bundles_post_ra>
// kernel: tpu_custom_call.1
= control target key start
LH: loop header
LB: loop body
LE: loop exit
PB: predicated region body
PF: predicated region fallthrough
CT: control target
= control target key end

     0   :  { %9 = vsyncpa [#allocation3], 0  ;;  %s268_s0 = inlined_call_operand.vmem [shape: s32[8,1], index: 0, kind: input, shape index: {}]   ;;  %s269_s1 = inlined_call_operand.hbm [shape: bf16[32,128], index: 1, kind: input, shape index: {}]   ;;  %s270_s2 = inlined_call_operand.vmem [shape: f32[1,128], index: 2, kind: input, shape index: {}]   ;;  %s271_s3 = inlined_call_operand.vmem [shape: f32[1,128], index: 3, kind: input, shape index: {}]   ;;  %s272_s4 = inlined_call_operand.hbm [shape: bf16[8,128], index: 4, kind: output, shape index: {}]  }
   0x1   :  { %10 = vsyncpa [#allocation4], 0  ;;  %s221_s15 = smov [#allocation2]  }
   0x2   :  { %s18_s16 = sshll.u32 %s221_s15, 4  ;;  %s19_s16 = int_to_ptr.vmem [resolvable:$true] %s18_s16 }
   0x3   :  { %s185_s17 = scalar_lea.vmem %s19_s16, 256  ;;  %p190_p1 = scmp.lt.s32.totalorder %s19_s16, %s19_s16 }
   0x4   :  { %p186_p0 = scmp.ne.s32.totalorder %s19_s16, %s185_s17  ;;  %p191_p2 = scmp.lt.s32.totalorder %s185_s17, %s185_s17 }
   0x6   :  { %p192_p3 = por %p191_p2, %p190_p1 }
   0x8   :  { %p193_p4 = pnand %p192_p3, %p186_p0 }
   0xa   :  { %196 = shalt.err (!%p193_p4)
}
   0xb   :  { %s222_s18 = smov 64   ;;  %s223_s19 = smov 4  }
   0xc   :  { %24 = dma.hbm_to_vmem [thread:$0]  %s269_s1, 256, %s19_s16, [#allocation3], %s222_s18, %s222_s18, %s223_s19  }
   0xd   :  { %217 = dma.done.wait [#allocation3], 256  }
   0xe   :  { %218 = vsyncadd [#allocation3], 4294967040  ;;  %v224_v0 = vmov 0   ;;  %v225_v1 = vmov 0.0   ;;  %v33_v2 = vld [vmem:[%s268_s0] sm:$0xff]  ;;  %vm226_vm0 = vmmov 0   ;;  %v34_v5 = vlaneseq }
   0xf   :  { %172 = vset.pattern.permute.xlu0 %v224_v0  ;;  %157 = vmatprep.subr.bf16.mxu0 %v225_v1  ;;  %v173_v3 = vld [vmem:[#allocation2 + $0x8] sm:$0xff]   ;;  %v174_v4 = vld [vmem:[#allocation2] sm:$0xff]   ;;  %vm59_vm2 = vcmask 261120   ;;  %s227_s26 = smov [#allocation5]  }
  0x10   :  { %161 = vmatprep.mubr.msk.bf16.mxu0 %vm226_vm0, %v225_v1  ;;  %37 = vperm.xlu0 %172, %v33_v2   ;;  %v35_v6 = vand.u32 127, %v34_v5  ;;  %v152_v22 = vld [vmem:[%s270_s2] ss:$0 sm:$0xff]  ;;  %s139_s27 = sshll.u32 %s227_s26, 4  ;;  %s140_s27 = int_to_ptr.vmem [resolvable:$true] %s139_s27 }
  0x11   :  { %158 = vmatpush3.bf16.msra.mxu0 %v173_v3  ;;  %v153_v24 = vld [vmem:[%s271_s3] ss:$0 sm:$0xff]  ;;  %s197_s28 = scalar_lea.vmem %s140_s27, 64  ;;  %p202_p6 = scmp.lt.s32.totalorder %s140_s27, %s140_s27 }
  0x12   :  { %159 = vmatprep.subr.bf16.mxu0 %v225_v1  ;;  %p198_p5 = scmp.ne.s32.totalorder %s140_s27, %s197_s28  ;;  %p203_p7 = scmp.lt.s32.totalorder %s197_s28, %s197_s28 }
  0x14   :  { %p204_p8 = por %p203_p7, %p202_p6 }
  0x15   :  { %160 = vmatpush3.bf16.msra.mxu0 %v174_v4 }
  0x16   :  { %p205_p9 = pnand %p204_p8, %p198_p5 }
  0x8b   :  { %v38_v7 = vpop.permute.xlu0 %37 }
  0x8c   :  { %vm39_vm1 = vcmp.eq.s32.totalorder %v38_v7, %v35_v6 }
  0x8d   :  { %v148_v8 = vsel %vm39_vm1, 1.0, %v225_v1 }
  0x8e   :  { %v42_v9 = vpack.c.bf16 %v148_v8, %v148_v8 }
  0x90   :  { %162 = vmatmul.mubr.msk.bf16.vlgmr.msra.gmra.mxu0 %vm59_vm2, %v42_v9 }
 0x150   :  { %v97_v10 = vpop.f32.mrf.mxu0 }
 0x151   :  { %103 = vadd.xlane.f32.xlu0 %v97_v10 }
 0x152   :  { %v163_v11 = vpop.f32.mrf.mxu0 }
 0x154   :  { %v100_v12 = vpop.f32.mrf.mxu0 }
 0x156   :  { %v164_v13 = vpop.f32.mrf.mxu0 }
 0x1da   :  { %v104_v14 = vpop.xlane.xlu0 %103 }
 0x1db   :  { %v106_v15 = vmul.f32 0.0078125, %v104_v14 }
 0x1dd   :  { %v107_v16 = vsub.f32 %v97_v10, %v106_v15 }
 0x1df   :  { %v108_v17 = vmul.f32 %v107_v16, %v107_v16 }
 0x1e1   :  { %109 = vadd.xlane.f32.xlu1 %v108_v17 }
 0x26a   :  { %v110_v18 = vpop.xlane.xlu1 %109 }
 0x26b   :  { %v111_v19 = vmul.f32 0.0078125, %v110_v18 }
 0x26d   :  { %v112_v20 = vadd.f32 1e-05, %v111_v19 }
 0x26f   :  { %175 = vrsqrt.f32 %v112_v20 }
 0x27c   :  { %v176_v21 = vpop.eup %175 }
 0x27d   :  { %v114_v23 = vmul.f32 %v176_v21, %v107_v16 }
 0x27f   :  { %v122_v25 = vmul.f32 %v152_v22, %v114_v23 }
 0x281   :  { %v130_v26 = vadd.f32 %v153_v24, %v122_v25 }
 0x283   :  { %v131_v27 = vpack.c.bf16 %v130_v26, %v130_v26 }
 0x285   :  { %132 = vst [vmem:[#allocation5] sm:$0xf] %v131_v27 }
 0x286   :  { %208 = shalt.err (!%p205_p9)
}
 0x287   :  { %142 = dma.vmem_to_hbm [thread:$0]  %s140_s27, 64, %s272_s4, [#allocation4]  }
 0x288   :  { %219 = dma.done.wait [#allocation4], 64  }
 0x289   :  { %220 = vsyncadd [#allocation4], 4294967232 }
 0x28a   :  { %146 = vsyncpa [#allocation3], 1 }
 0x28b   :  { %147 = vsyncpa [#allocation4], 1 }

</bundles_post_ra>
